<compile_context>
chip_gen: v5e
topology: v5e:2x2
jax: 0.10.0
libtpu: 0.0.40
codegen_flags: <defaults>
</compile_context>

<pallas_src>
import functools

import jax
import jax.numpy as jnp
import numpy as np
from jax.experimental import pallas as pl
from jax.experimental.pallas import tpu as pltpu

_VMEM_LIMIT_BYTES = 48 * 1024 * 1024   # safely below v7x's 64 MiB physical VMEM


# ----------------------------------------------------------------------------
# Kernels
# ----------------------------------------------------------------------------
def _bn_fused_kernel(mu_ref, sigma_ref, mu_out_ref, sig_out_ref, *, n_total, eps):
    """Single-pass stats + normalize; used when everything fits in VMEM.

    mu / sigma / outputs : (B, C, HW)
    """
    mu = mu_ref[...].astype(jnp.float32)
    sig = sigma_ref[...].astype(jnp.float32)

    inv_n = 1.0 / n_total
    # Reduce the lane axis (HW) first, then the outer (batch) axis; keepdims
    # keeps C on the sublane axis so the broadcasts below are cheap lane splats.
    mean = jnp.sum(jnp.sum(mu, axis=2, keepdims=True), axis=0, keepdims=True) * inv_n
    centered = mu - mean
    var_b = jnp.sum(jnp.sum(centered * centered, axis=2, keepdims=True),
                    axis=0, keepdims=True) * inv_n                  # biased (BN)
    var_u = var_b * (n_total / max(n_total - 1.0, 1.0))             # unbiased (torch.var)

    mu_out_ref[...] = (centered * jax.lax.rsqrt(var_b + eps)).astype(mu_out_ref.dtype)
    sig_out_ref[...] = (sig * (1.0 / (var_u + eps))).astype(sig_out_ref.dtype)


def _bn_stats_kernel(mu_ref, stats_ref, shift_sc, s1_sc, s2_sc, *, n_total, eps):
    """Pass 1: per-channel statistics, reduced over batch blocks.

    mu_ref    : (tb, tc, HW)   current block
    stats_ref : (tc, 3)        [mean, 1/sqrt(var_biased+eps), 1/(var_unbiased+eps)]
    shift_sc  : (tc, 1)        per-channel shift (stable shifted sum-of-squares)
    s1_sc     : (tc, 1)        running sum of (x - shift)
    s2_sc     : (tc, 1)        running sum of (x - shift)^2
    """
    b = pl.program_id(1)

    x = mu_ref[...].astype(jnp.float32)

    @pl.when(b == 0)
    def _():
        shift_sc[...] = x[0, :, 0:1]
        s1_sc[...] = jnp.zeros_like(s1_sc)
        s2_sc[...] = jnp.zeros_like(s2_sc)

    xs = x - shift_sc[...][None, :, :]                                  # (tb, tc, HW)
    s1_sc[...] += jnp.sum(jnp.sum(xs, axis=2, keepdims=True), axis=0)   # (tc, 1)
    s2_sc[...] += jnp.sum(jnp.sum(xs * xs, axis=2, keepdims=True), axis=0)

    @pl.when(b == pl.num_programs(1) - 1)
    def _():
        inv_n = 1.0 / n_total
        m_s = s1_sc[...] * inv_n                              # mean of shifted values
        mean = shift_sc[...] + m_s
        var_b = jnp.maximum(s2_sc[...] * inv_n - m_s * m_s, 0.0)        # biased
        var_u = var_b * (n_total / max(n_total - 1.0, 1.0))             # unbiased
        stats_ref[:, 0:1] = mean.astype(stats_ref.dtype)
        stats_ref[:, 1:2] = jax.lax.rsqrt(var_b + eps).astype(stats_ref.dtype)
        stats_ref[:, 2:3] = (1.0 / (var_u + eps)).astype(stats_ref.dtype)


def _bn_apply_kernel(mu_ref, sigma_ref, stats_ref, mu_out_ref, sig_out_ref):
    """Pass 2: elementwise normalization with per-channel scales.

    mu / sigma / outputs : (tb, tc, HW)
    stats_ref            : (tc, 3)  (C on sublanes -> only a lane splat needed)
    """
    stats = stats_ref[...].astype(jnp.float32)
    mean = stats[:, 0:1][None, :, :]        # (1, tc, 1)
    mu_scale = stats[:, 1:2][None, :, :]
    sig_scale = stats[:, 2:3][None, :, :]

    mu = mu_ref[...].astype(jnp.float32)
    sig = sigma_ref[...].astype(jnp.float32)
    mu_out_ref[...] = ((mu - mean) * mu_scale).astype(mu_out_ref.dtype)
    sig_out_ref[...] = (sig * sig_scale).astype(sig_out_ref.dtype)


# ----------------------------------------------------------------------------
# Trace-time tile selection (all static)
# ----------------------------------------------------------------------------
def _pick_channel_tile(C, cap):
    """Largest channel tile that divides C, satisfies the sublane constraint
    (multiple of 8 or == C), and fits `cap` rows when possible."""
    valid = [d for d in range(8, C + 1, 8) if C % d == 0] + [C]
    fitting = [d for d in valid if d <= cap]
    return max(fitting) if fitting else min(valid)


def _pick_batch_tile(B, cap):
    cap = max(int(cap), 1)
    fitting = [d for d in range(1, B + 1) if B % d == 0 and d <= cap]
    return max(fitting) if fitting else 1


# ----------------------------------------------------------------------------
# Wrapper
# ----------------------------------------------------------------------------
@functools.partial(jax.jit,
                   static_argnames=("eps", "block_budget_bytes", "fuse_threshold_bytes"))
def vdp_batchnorm2d(mu, sigma, *, eps=1e-5,
                    block_budget_bytes=4 * 1024 * 1024,
                    fuse_threshold_bytes=4 * 1024 * 1024):
    """Pallas implementation of VDP_BatchNorm2D.forward (training mode).

    mu, sigma : [B, C, H, W]  ->  (mu_bn, sigma_bn), same shape/dtype.
    """
    B, C, H, W = mu.shape
    HW = H * W
    n_total = float(B * H * W)
    itemsize = mu.dtype.itemsize
    eps = float(eps)

    mu3 = mu.reshape(B, C, HW)
    sigma3 = sigma.reshape(B, C, HW)
    array_bytes = B * C * HW * itemsize

    # ------------------ Fused single-pass path (small problems) ------------------
    if array_bytes <= fuse_threshold_bytes:
        full_spec = pl.BlockSpec((B, C, HW), lambda i: (0, 0, 0))
        mu_bn3, sigma_bn3 = pl.pallas_call(
            functools.partial(_bn_fused_kernel, n_total=n_total, eps=eps),
            out_shape=(jax.ShapeDtypeStruct((B, C, HW), mu.dtype),
                       jax.ShapeDtypeStruct((B, C, HW), sigma.dtype)),
            grid=(1,),
            in_specs=[full_spec, full_spec],
            out_specs=(full_spec, full_spec),
            compiler_params=pltpu.CompilerParams(
                dimension_semantics=("arbitrary",),
                vmem_limit_bytes=_VMEM_LIMIT_BYTES),
            cost_estimate=pl.CostEstimate(
                flops=int(7 * B * C * HW),
                transcendentals=int(C),
                bytes_accessed=int(4 * array_bytes)),
        )(mu3, sigma3)
        return mu_bn3.reshape(B, C, H, W), sigma_bn3.reshape(B, C, H, W)

    # ------------------------- Two-pass tiled path -------------------------
    # Size (tb, tc) from the per-array VMEM budget; HW stays whole on lanes.
    # tb | B and tc | C exactly -> no padding, no ragged blocks anywhere.
    max_rows = max(1, block_budget_bytes // max(HW * itemsize, 1))
    tc = _pick_channel_tile(C, max_rows)
    tb = _pick_batch_tile(B, max_rows // tc)
    nc, nb = C // tc, B // tb

    blk_spec = pl.BlockSpec((tb, tc, HW), lambda c, b: (b, c, 0))
    stat_spec = pl.BlockSpec((tc, 3), lambda c, b: (c, 0))

    # Pass 1: per-channel stats.  Channel blocks are independent ("parallel",
    # shardable across v7x's two TensorCores); batch blocks reduce ("arbitrary").
    stats = pl.pallas_call(
        functools.partial(_bn_stats_kernel, n_total=n_total, eps=eps),
        out_shape=jax.ShapeDtypeStruct((C, 3), jnp.float32),
        grid=(nc, nb),
        in_specs=[blk_spec],
        out_specs=stat_spec,
        scratch_shapes=[pltpu.VMEM((tc, 1), jnp.float32),
                        pltpu.VMEM((tc, 1), jnp.float32),
                        pltpu.VMEM((tc, 1), jnp.float32)],
        compiler_params=pltpu.CompilerParams(
            dimension_semantics=("parallel", "arbitrary"),
            vmem_limit_bytes=_VMEM_LIMIT_BYTES),
        cost_estimate=pl.CostEstimate(
            flops=int(4 * B * C * HW),
            transcendentals=int(C),
            bytes_accessed=int(array_bytes + C * 3 * 4)),
    )(mu3)

    # Pass 2: elementwise normalization; every block independent.
    mu_bn3, sigma_bn3 = pl.pallas_call(
        _bn_apply_kernel,
        out_shape=(jax.ShapeDtypeStruct((B, C, HW), mu.dtype),
                   jax.ShapeDtypeStruct((B, C, HW), sigma.dtype)),
        grid=(nc, nb),
        in_specs=[blk_spec, blk_spec, stat_spec],
        out_specs=(blk_spec, blk_spec),
        compiler_params=pltpu.CompilerParams(
            dimension_semantics=("parallel", "parallel"),
            vmem_limit_bytes=_VMEM_LIMIT_BYTES),
        cost_estimate=pl.CostEstimate(
            flops=int(3 * B * C * HW),
            transcendentals=0,
            bytes_accessed=int(4 * array_bytes + C * 3 * 4)),
    )(mu3, sigma3, stats)

    return mu_bn3.reshape(B, C, H, W), sigma_bn3.reshape(B, C, H, W)


# ----------------------------------------------------------------------------
# Pure-JAX reference (mirrors the PyTorch forward exactly)
# ----------------------------------------------------------------------------
def vdp_batchnorm2d_reference(mu, sigma, *, eps=1e-5):
    mean = jnp.mean(mu, axis=(0, 2, 3), keepdims=True)
    var_b = jnp.mean((mu - mean) ** 2, axis=(0, 2, 3), keepdims=True)   # biased (BN)
    n = mu.shape[0] * mu.shape[2] * mu.shape[3]
    var_u = var_b * (n / (n - 1.0))                                      # torch.var default
    mu_bn = (mu - mean) / jnp.sqrt(var_b + eps)
    sigma_bn = sigma / (var_u + eps)
    return mu_bn, sigma_bn


def _check(name, got, want, rtol=1e-4, atol=1e-4):
    for g, w in zip(got, want):
        g = np.asarray(g)
        w = np.asarray(w)
        err = float(np.max(np.abs(g - w)))
        assert np.allclose(g, w, rtol=rtol, atol=atol), f"{name}: max abs err {err}"


# ----------------------------------------------------------------------------
if __name__ == "__main__":
    key = jax.random.PRNGKey(0)
    k_mu, k_sig, k_mu2, k_sig2 = jax.random.split(key, 4)

    # Small demo shape (exercises the fused single-pass path).
    B, C, H, W = 2, 4, 16, 16
    mu = jax.random.normal(k_mu, (B, C, H, W), dtype=jnp.float32)
    sigma = jax.nn.softplus(jax.random.normal(k_sig, (B, C, H, W), dtype=jnp.float32))
    ref = vdp_batchnorm2d_reference(mu, sigma, eps=1e-5)

    out_fused = vdp_batchnorm2d(mu, sigma, eps=1e-5)
    jax.block_until_ready(out_fused)
    _check("fused", out_fused, ref)

    # Same input through the two-pass tiled path (forced; single grid step).
    out_two = vdp_batchnorm2d(mu, sigma, eps=1e-5, fuse_threshold_bytes=0)
    jax.block_until_ready(out_two)
    _check("two-pass", out_two, ref)

    # Larger, non-centered input with a tiny block budget to force a multi-step
    # (channel x batch) grid and exercise the shifted-sum accumulation.
    B2, C2, H2, W2 = 6, 16, 16, 16
    mu2 = 3.0 + jax.random.normal(k_mu2, (B2, C2, H2, W2), dtype=jnp.float32)
    sigma2 = jax.nn.softplus(jax.random.normal(k_sig2, (B2, C2, H2, W2), dtype=jnp.float32))
    ref2 = vdp_batchnorm2d_reference(mu2, sigma2, eps=1e-5)

    out_tiled = vdp_batchnorm2d(mu2, sigma2, eps=1e-5,
                                fuse_threshold_bytes=0,
                                block_budget_bytes=8 * 1024)
    jax.block_until_ready(out_tiled)
    _check("tiled", out_tiled, ref2)

    print("KERNEL_OK")
</pallas_src>

<mosaic_0001>
module attributes {stable_mosaic.version = 11 : i64} {
  func.func @_bn_fused_kernel(%arg0: i32, %arg1: memref<2x4x256xf32, #tpu.memory_space<vmem>>, %arg2: memref<2x4x256xf32, #tpu.memory_space<vmem>>, %arg3: memref<2x4x256xf32, #tpu.memory_space<vmem>>, %arg4: memref<2x4x256xf32, #tpu.memory_space<vmem>>) attributes {dimension_semantics = [#tpu.dimension_semantics<arbitrary>], iteration_bounds = array<i64: 1>, scalar_prefetch = 0 : i64, scratch_operands = 0 : i64, tpu.core_type = #tpu.core_type<tc>, window_params = [{pipeline_mode = #tpu.pipeline_mode<synchronous>, transform_indices = @transform_0, window_bounds = array<i64: 2, 4, 256>}, {pipeline_mode = #tpu.pipeline_mode<synchronous>, transform_indices = @transform_1, window_bounds = array<i64: 2, 4, 256>}, {pipeline_mode = #tpu.pipeline_mode<synchronous>, transform_indices = @transform_2, window_bounds = array<i64: 2, 4, 256>}, {pipeline_mode = #tpu.pipeline_mode<synchronous>, transform_indices = @transform_3, window_bounds = array<i64: 2, 4, 256>}]} {
    %c0 = arith.constant 0 : index
    %c0_0 = arith.constant 0 : index
    %c0_1 = arith.constant 0 : index
    %0 = vector.load %arg1[%c0, %c0_0, %c0_1] : memref<2x4x256xf32, #tpu.memory_space<vmem>>, vector<2x4x256xf32>
    %c0_2 = arith.constant 0 : index
    %c0_3 = arith.constant 0 : index
    %c0_4 = arith.constant 0 : index
    %1 = vector.load %arg2[%c0_2, %c0_3, %c0_4] : memref<2x4x256xf32, #tpu.memory_space<vmem>>, vector<2x4x256xf32>
    %cst = arith.constant dense<0.000000e+00> : vector<2x4xf32>
    %2 = vector.multi_reduction <add>, %0, %cst [2] : vector<2x4x256xf32> to vector<2x4xf32>
    %3 = vector.shape_cast %2 : vector<2x4xf32> to vector<2x4x1xf32>
    %cst_5 = arith.constant dense<0.000000e+00> : vector<4x1xf32>
    %4 = vector.multi_reduction <add>, %3, %cst_5 [0] : vector<2x4x1xf32> to vector<4x1xf32>
    %5 = vector.shape_cast %4 : vector<4x1xf32> to vector<1x4x1xf32>
    %cst_6 = arith.constant 0.001953125 : f32
    %6 = vector.broadcast %cst_6 : f32 to vector<1x4x1xf32>
    %7 = arith.mulf %5, %6 : vector<1x4x1xf32>
    %8 = vector.broadcast %7 : vector<1x4x1xf32> to vector<2x4x256xf32>
    %9 = arith.subf %0, %8 : vector<2x4x256xf32>
    %10 = arith.mulf %9, %9 : vector<2x4x256xf32>
    %cst_7 = arith.constant dense<0.000000e+00> : vector<2x4xf32>
    %11 = vector.multi_reduction <add>, %10, %cst_7 [2] : vector<2x4x256xf32> to vector<2x4xf32>
    %12 = vector.shape_cast %11 : vector<2x4xf32> to vector<2x4x1xf32>
    %cst_8 = arith.constant dense<0.000000e+00> : vector<4x1xf32>
    %13 = vector.multi_reduction <add>, %12, %cst_8 [0] : vector<2x4x1xf32> to vector<4x1xf32>
    %14 = vector.shape_cast %13 : vector<4x1xf32> to vector<1x4x1xf32>
    %cst_9 = arith.constant 0.001953125 : f32
    %15 = vector.broadcast %cst_9 : f32 to vector<1x4x1xf32>
    %16 = arith.mulf %14, %15 : vector<1x4x1xf32>
    %cst_10 = arith.constant 1.00195694 : f32
    %17 = vector.broadcast %cst_10 : f32 to vector<1x4x1xf32>
    %18 = arith.mulf %16, %17 : vector<1x4x1xf32>
    %cst_11 = arith.constant 9.99999974E-6 : f32
    %19 = vector.broadcast %cst_11 : f32 to vector<1x4x1xf32>
    %20 = arith.addf %16, %19 : vector<1x4x1xf32>
    %21 = math.rsqrt %20 : vector<1x4x1xf32>
    %22 = vector.broadcast %21 : vector<1x4x1xf32> to vector<2x4x256xf32>
    %23 = arith.mulf %9, %22 : vector<2x4x256xf32>
    %c0_12 = arith.constant 0 : index
    %c0_13 = arith.constant 0 : index
    %c0_14 = arith.constant 0 : index
    %24 = vector.load %arg3[%c0_12, %c0_13, %c0_14] : memref<2x4x256xf32, #tpu.memory_space<vmem>>, vector<2x4x256xf32>
    tpu.vector_store %arg3[%c0_12, %c0_13, %c0_14], %23 {strides = array<i32>} : memref<2x4x256xf32, #tpu.memory_space<vmem>>, vector<2x4x256xf32>,
    %cst_15 = arith.constant 9.99999974E-6 : f32
    %25 = vector.broadcast %cst_15 : f32 to vector<1x4x1xf32>
    %26 = arith.addf %18, %25 : vector<1x4x1xf32>
    %cst_16 = arith.constant 1.000000e+00 : f32
    %27 = vector.broadcast %cst_16 : f32 to vector<1x4x1xf32>
    %28 = arith.divf %27, %26 : vector<1x4x1xf32>
    %29 = vector.broadcast %28 : vector<1x4x1xf32> to vector<2x4x256xf32>
    %30 = arith.mulf %1, %29 : vector<2x4x256xf32>
    %c0_17 = arith.constant 0 : index
    %c0_18 = arith.constant 0 : index
    %c0_19 = arith.constant 0 : index
    %31 = vector.load %arg4[%c0_17, %c0_18, %c0_19] : memref<2x4x256xf32, #tpu.memory_space<vmem>>, vector<2x4x256xf32>
    tpu.vector_store %arg4[%c0_17, %c0_18, %c0_19], %30 {strides = array<i32>} : memref<2x4x256xf32, #tpu.memory_space<vmem>>, vector<2x4x256xf32>,
    return
  }
  func.func @transform_0(%arg0: i32) -> (i32, i32, i32) {
    %c0_i32 = arith.constant 0 : i32
    %c0_i32_0 = arith.constant 0 : i32
    %c0_i32_1 = arith.constant 0 : i32
    %c0_i32_2 = arith.constant 0 : i32
    return %c0_i32, %c0_i32_0, %c0_i32_1 : i32, i32, i32
  }
  func.func @transform_1(%arg0: i32) -> (i32, i32, i32) {
    %c0_i32 = arith.constant 0 : i32
    %c0_i32_0 = arith.constant 0 : i32
    %c0_i32_1 = arith.constant 0 : i32
    %c0_i32_2 = arith.constant 0 : i32
    return %c0_i32, %c0_i32_0, %c0_i32_1 : i32, i32, i32
  }
  func.func @transform_2(%arg0: i32) -> (i32, i32, i32) {
    %c0_i32 = arith.constant 0 : i32
    %c0_i32_0 = arith.constant 0 : i32
    %c0_i32_1 = arith.constant 0 : i32
    %c0_i32_2 = arith.constant 0 : i32
    return %c0_i32, %c0_i32_0, %c0_i32_1 : i32, i32, i32
  }
  func.func @transform_3(%arg0: i32) -> (i32, i32, i32) {
    %c0_i32 = arith.constant 0 : i32
    %c0_i32_0 = arith.constant 0 : i32
    %c0_i32_1 = arith.constant 0 : i32
    %c0_i32_2 = arith.constant 0 : i32
    return %c0_i32, %c0_i32_0, %c0_i32_1 : i32, i32, i32
  }
}

</mosaic_0001>

<bundles_post_ra>
// kernel: vdp_batchnorm2d.1
= control target key start
LH: loop header
LB: loop body
LE: loop exit
PB: predicated region body
PF: predicated region fallthrough
CT: control target
= control target key end

     0   :  { %vm30_vm0 = vcmask 1043456   ;;  %v143_v13 = vmov 839922192   ;;  %s200_s0 = inlined_call_operand.vmem [shape: f32[2,4,256], index: 0, kind: input, shape index: {}]   ;;  %s201_s1 = inlined_call_operand.vmem [shape: f32[2,4,256], index: 1, kind: input, shape index: {}]   ;;  %s202_s2 = inlined_call_operand.vmem [shape: f32[2,4,256], index: 2, kind: output, shape index: {0}]   ;;  %s203_s3 = inlined_call_operand.vmem [shape: f32[2,4,256], index: 3, kind: output, shape index: {1}]  }
   0x1   :  { %v13_v0 = vld [vmem:[%s200_s0] sm:$0xff]  ;;  %v14_v1 = vld [vmem:[%s200_s0 + $0x8] sm:$0xff]  ;;  %v47_v14 = vunpack.c.l.s4 %v143_v13 }
   0x2   :  { %19 = vst [vmem:[#allocation1] ss:$2 sm:$0xff] %v13_v0  ;;  %v15_v61 = vld [vmem:[%s201_s1] sm:$0xff]  ;;  %v16_v62 = vld [vmem:[%s201_s1 + $0x8] sm:$0xff] }
   0x3   :  { %23 = vst [vmem:[#allocation1 + $0x10] ss:$2 sm:$0xff] %v14_v1  ;;  %v48_v18 = vunpack.c.0.s8 %v47_v14 }
   0x9   :  { %v20_v2 = vld.sshfl [vmem:[#allocation1] sm:$0xff pattern:$0x75316420]  ;;  %v21_v3 = vld.sshfl [vmem:[#allocation1 + $0x8] sm:$0xff pattern:$0x75316420] }
   0xa   :  { %v31_v4 = vsel %vm30_vm0, %v20_v2, 0.0  ;;  %v32_v5 = vsel %vm30_vm0, %v21_v3, 0.0  ;;  %v24_v7 = vld.sshfl [vmem:[#allocation1 + $0x10] sm:$0xff pattern:$0x75316420] }
   0xb   :  { %v33_v6 = vadd.f32 %v32_v5, %v31_v4  ;;  %v25_v8 = vld.sshfl [vmem:[#allocation1 + $0x18] sm:$0xff pattern:$0x75316420]  ;;  %v36_v9 = vsel %vm30_vm0, %v24_v7, 0.0 }
   0xc   :  { %v37_v10 = vsel %vm30_vm0, %v25_v8, 0.0 }
   0xd   :  { %34 = vadd.xlane.f32.xlu0 %v33_v6  ;;  %v38_v11 = vadd.f32 %v37_v10, %v36_v9 }
  0x15   :  { %39 = vadd.xlane.f32.xlu0 %v38_v11 }
  0x80   :  { %v35_v12 = vpop.xlane.xlu0 %34 }
  0x81   :  { %v41_v16 = vsel %vm30_vm0, %v35_v12, 0.0 }
  0x88   :  { %v40_v15 = vpop.xlane.xlu0 %39 }
  0x89   :  { %v42_v17 = vsel %vm30_vm0, %v40_v15, 0.0 }
  0x8a   :  { %v43_v19 = vadd.f32 %v42_v17, %v41_v16 }
  0x8c   :  { %v44_v20 = vmul.f32 0.001953125, %v43_v19 }
  0x8e   :  { %v49_v21 = vperm.slane %v44_v20, %v48_v18 }
  0x90   :  { %v51_v22 = vsub.f32 %v13_v0, %v49_v21  ;;  %v52_v23 = vsub.f32 %v14_v1, %v49_v21 }
  0x92   :  { %v53_v24 = vmul.f32 %v51_v22, %v51_v22  ;;  %v54_v25 = vmul.f32 %v52_v23, %v52_v23 }
  0x94   :  { %57 = vst [vmem:[#allocation1] ss:$2 sm:$0xff] %v53_v24 }
  0x95   :  { %61 = vst [vmem:[#allocation1 + $0x10] ss:$2 sm:$0xff] %v54_v25 }
  0x9b   :  { %v58_v26 = vld.sshfl [vmem:[#allocation1] sm:$0xff pattern:$0x75316420]  ;;  %v59_v27 = vld.sshfl [vmem:[#allocation1 + $0x8] sm:$0xff pattern:$0x75316420] }
  0x9c   :  { %v68_v28 = vsel %vm30_vm0, %v58_v26, 0.0  ;;  %v69_v29 = vsel %vm30_vm0, %v59_v27, 0.0  ;;  %v62_v31 = vld.sshfl [vmem:[#allocation1 + $0x10] sm:$0xff pattern:$0x75316420] }
  0x9d   :  { %v70_v30 = vadd.f32 %v69_v29, %v68_v28  ;;  %v63_v32 = vld.sshfl [vmem:[#allocation1 + $0x18] sm:$0xff pattern:$0x75316420]  ;;  %v73_v33 = vsel %vm30_vm0, %v62_v31, 0.0 }
  0x9e   :  { %v74_v34 = vsel %vm30_vm0, %v63_v32, 0.0 }
  0x9f   :  { %71 = vadd.xlane.f32.xlu1 %v70_v30  ;;  %v75_v35 = vadd.f32 %v74_v34, %v73_v33 }
  0xa7   :  { %76 = vadd.xlane.f32.xlu1 %v75_v35 }
 0x112   :  { %v72_v36 = vpop.xlane.xlu1 %71 }
 0x113   :  { %v78_v38 = vsel %vm30_vm0, %v72_v36, 0.0 }
 0x11a   :  { %v77_v37 = vpop.xlane.xlu1 %76 }
 0x11b   :  { %v79_v39 = vsel %vm30_vm0, %v77_v37, 0.0 }
 0x11c   :  { %v80_v40 = vadd.f32 %v79_v39, %v78_v38 }
 0x11e   :  { %v81_v41 = vmul.f32 0.001953125, %v80_v40 }
 0x120   :  { %v82_v42 = vmul.f32 1.0019569, %v81_v41  ;;  %v83_v43 = vadd.f32 1e-05, %v81_v41 }
 0x122   :  { %139 = vrsqrt.f32 %v83_v43  ;;  %v104_v44 = vadd.f32 1e-05, %v82_v42  ;;  %vm90_vm3 = vweird.f32 %v83_v43 }
 0x124   :  { %141 = vrcp.f32 %v104_v44  ;;  %v116_v52 = vand.u32 2147483648, %v104_v44  ;;  %v114_v55 = vand.u32 2147483647, %v104_v44  ;;  %vm110_vm5 = vweird.f32 %v104_v44 }
 0x126   :  { %v117_v58 = vor.u32 1.1754944e-38, %v116_v52  ;;  %vm115_vm7 = vcmp.eq.f32.partialorder %v114_v55, 8.507059e+37 }
 0x128   :  { %v140_v45 = vpop.eup %139 }
 0x129   :  { %v85_v46 = vmul.f32 %v140_v45, %v83_v43  ;;  %vm91_vm1 = vweird.f32 %v140_v45 }
 0x12a   :  { %v142_v47 = vpop.eup %141  ;;  %vm92_vm4 = vmor %vm90_vm3, %vm91_vm1 }
 0x12b   :  { %v86_v48 = vmul.f32 %v140_v45, %v85_v46  ;;  %v106_v49 = vmul.f32 %v142_v47, %v104_v44  ;;  %vm111_vm2 = vweird.f32 %v142_v47 }
 0x12c   :  { %vm112_vm6 = vmor %vm110_vm5, %vm111_vm2 }
 0x12d   :  { %v87_v50 = vmul.f32 0.5, %v86_v48  ;;  %v107_v51 = vsub.f32 1.0, %v106_v49 }
 0x12f   :  { %v88_v53 = vsub.f32 1.5, %v87_v50  ;;  %v108_v54 = vmul.f32 %v142_v47, %v107_v51 }
 0x131   :  { %v89_v56 = vmul.f32 %v140_v45, %v88_v53  ;;  %v109_v57 = vadd.f32 %v142_v47, %v108_v54 }
 0x133   :  { %v93_v59 = vsel %vm92_vm4, %v140_v45, %v89_v56  ;;  %v113_v60 = vsel %vm112_vm6, %v142_v47, %v109_v57 }
 0x134   :  { %v98_v63 = vperm.slane %v93_v59, %v48_v18  ;;  %v118_v0 = vsel %vm115_vm7, %v117_v58, %v113_v60 }
 0x135   :  { %v124_v1 = vperm.slane %v118_v0, %v48_v18 }
 0x136   :  { %v100_v2 = vmul.f32 %v98_v63, %v51_v22  ;;  %v101_v3 = vmul.f32 %v98_v63, %v52_v23 }
 0x137   :  { %v126_v4 = vmul.f32 %v124_v1, %v15_v61  ;;  %v127_v5 = vmul.f32 %v124_v1, %v16_v62 }
 0x138   :  { %102 = vst [vmem:[%s202_s2] sm:$0xff] %v100_v2 }
 0x139   :  { %103 = vst [vmem:[%s202_s2 + $0x8] sm:$0xff] %v101_v3 }
 0x13a   :  { %128 = vst [vmem:[%s203_s3] sm:$0xff] %v126_v4 }
 0x13b   :  { %129 = vst [vmem:[%s203_s3 + $0x8] sm:$0xff] %v127_v5 }

</bundles_post_ra>
